<compile_context>
chip_gen: v6e
topology: v6e:2x2x1
jax: 0.10.0
libtpu: 0.0.40
codegen_flags: <defaults>
</compile_context>

<pallas_src>
import functools

import jax
import jax.numpy as jnp
import numpy as np
from jax.experimental import pallas as pl
from jax.experimental.pallas import tpu as pltpu


def _round_up(x, m):
    return ((x + m - 1) // m) * m


def _qrdqn_loss_kernel(tq_ref, qv_ref, w_ref, out_ref, *, n_j, n_chunks, ic, n_i_pad):
    # tq_ref : (N,        128)  target quantiles, j on sublanes, batch on lanes
    # qv_ref : (Ni_pad,   128)  value  quantiles, i on sublanes, batch on lanes
    # w_ref  : (2*Ni_pad, 128)  rows [0:Ni_pad]=|tau_i|, rows [Ni_pad:]=|tau_i - 1|
    # out_ref: (8, 128)         lane-dense partial sums for this batch tile
    lanes = tq_ref.shape[-1]
    total = jnp.zeros((ic, lanes), jnp.float32)

    for c in range(n_chunks):                                   # static unroll over i-chunks
        qv_c = qv_ref[pl.ds(c * ic, ic), :]                     # (IC, 128)
        wpos_c = w_ref[pl.ds(c * ic, ic), :]                    # (IC, 128) |tau_i|
        wneg_c = w_ref[pl.ds(n_i_pad + c * ic, ic), :]          # (IC, 128) |tau_i - 1|

        def jbody(j, carry, qv_c=qv_c, wpos_c=wpos_c, wneg_c=wneg_c):
            tq_j = tq_ref[pl.ds(j, 1), :]                       # (1, 128) target row j
            td = tq_j - qv_c                                    # target[b,j] - value[b,i]
            a = jnp.abs(td)
            cl = jnp.minimum(a, 1.0)
            huber = cl * (a - 0.5 * cl)                         # 0.5*td^2 if |td|<=1 else |td|-0.5
            w = jnp.where(td < 0.0, wneg_c, wpos_c)             # |tau_i - 1{td<0}|
            return carry + w * huber

        total = jax.lax.fori_loop(0, n_j, jbody, total, unroll=min(8, n_j))

    # Fold the (IC, 128) vreg accumulator to an (8, 128) lane-dense partial (one tile).
    out_ref[...] = total.reshape(ic // 8, 8, lanes).sum(axis=0)


def qrdqn_loss(target_quantiles, quantile_values, tau):
    """target_quantiles: [B, N], quantile_values: [B, N], tau: [N, 1] or [N] -> scalar loss."""
    B, N = target_quantiles.shape
    assert quantile_values.shape == (B, N)
    tau = jnp.asarray(tau, jnp.float32).reshape(-1)
    assert tau.shape[0] == N

    TILE_B = 128
    b_pad = _round_up(B, TILE_B)
    num_b_tiles = b_pad // TILE_B

    # i-chunk height: a few vregs tall -> ~30-40 live vregs in the inner loop.
    ic = min(32, _round_up(N, 8))
    n_i_pad = _round_up(N, ic)
    n_chunks = n_i_pad // ic

    f32 = jnp.float32
    # Lane-dense layout: batch on the 128-wide lane axis, quantile index on sublanes.
    # TODO(synk): for B << 128 with N >= 128, lane-fill with the quantile axis instead.
    tq_t = jnp.pad(jnp.swapaxes(target_quantiles.astype(f32), 0, 1),
                   ((0, 0), (0, b_pad - B)))                          # (N, b_pad)
    qv_t = jnp.pad(jnp.swapaxes(quantile_values.astype(f32), 0, 1),
                   ((0, n_i_pad - N), (0, b_pad - B)))                # (Ni_pad, b_pad)

    # Packed, lane-broadcast quantile weights (padded i rows are 0 -> contribute 0).
    w_pos = jnp.pad(jnp.abs(tau), (0, n_i_pad - N))
    w_neg = jnp.pad(jnp.abs(tau - 1.0), (0, n_i_pad - N))
    w = jnp.broadcast_to(jnp.concatenate([w_pos, w_neg])[:, None],
                         (2 * n_i_pad, TILE_B)).astype(f32)

    # VMEM actually needed (double-buffered blocks + headroom); realistic QR-DQN N
    # (tens..hundreds) keeps this ~1 MiB.  Cap well below v7x's 64 MiB physical VMEM.
    block_bytes = 4 * TILE_B * (N + 3 * n_i_pad + 8)
    vmem_limit = int(min(max(8 * block_bytes, 16 * 1024 * 1024), 48 * 1024 * 1024))

    kernel = functools.partial(_qrdqn_loss_kernel, n_j=N, n_chunks=n_chunks,
                               ic=ic, n_i_pad=n_i_pad)

    cost = pl.CostEstimate(
        flops=10 * B * N * N,
        transcendentals=0,
        bytes_accessed=4 * (2 * B * N + 2 * N + num_b_tiles * 8 * TILE_B))

    partials = pl.pallas_call(
        kernel,
        out_shape=jax.ShapeDtypeStruct((8 * num_b_tiles, TILE_B), jnp.float32),
        grid=(num_b_tiles,),
        in_specs=[
            pl.BlockSpec((N, TILE_B), lambda ib: (0, ib)),            # target quantiles
            pl.BlockSpec((n_i_pad, TILE_B), lambda ib: (0, ib)),      # value quantiles
            pl.BlockSpec((2 * n_i_pad, TILE_B), lambda ib: (0, 0)),   # packed |tau|, |tau-1|
        ],
        out_specs=pl.BlockSpec((8, TILE_B), lambda ib: (ib, 0)),
        compiler_params=pltpu.CompilerParams(
            dimension_semantics=("parallel",),      # safe: disjoint per-tile outputs, no scratch
            vmem_limit_bytes=vmem_limit,
        ),
        cost_estimate=cost,
    )(tq_t, qv_t, w)

    # Tiny cross-tile / cross-lane reduction and mean normalization (true B*N*N count).
    return jnp.sum(partials) * np.float32(1.0 / (B * N * N))


def _reference_loss(target_quantiles, quantile_values, tau):
    # Pure-JAX reference mirroring the PyTorch module.
    td = target_quantiles[:, None, :] - quantile_values[:, :, None]
    huber = jnp.where(jnp.abs(td) <= 1.0, 0.5 * td ** 2, jnp.abs(td) - 0.5)
    ql = jnp.abs(tau[None, :, :] - (td < 0).astype(jnp.float32)) * huber
    return jnp.mean(ql)


if __name__ == "__main__":
    B, N = 2, 8  # batch=2, num_quantiles=8

    key = jax.random.PRNGKey(0)
    k1, k2 = jax.random.split(key)
    target_quantiles = jax.random.normal(k1, (B, N), dtype=jnp.float32)
    quantile_values = jax.random.normal(k2, (B, N), dtype=jnp.float32)

    # Deterministic quantile midpoints tau_i = (i + 0.5) / N, shape [N, 1]
    # (corresponds to a PyTorch `quantiles` tensor of shape [1, N, 1]).
    tau = ((jnp.arange(N, dtype=jnp.float32) + 0.5) / N).reshape(N, 1)

    loss = qrdqn_loss(target_quantiles, quantile_values, tau)
    loss = jax.block_until_ready(loss)

    ref = _reference_loss(target_quantiles, quantile_values, tau)
    assert jnp.allclose(loss, ref, rtol=1e-5, atol=1e-6), (loss, ref)

    print("KERNEL_OK")
</pallas_src>

<mosaic_0001>
module attributes {stable_mosaic.version = 11 : i64} {
  func.func @_qrdqn_loss_kernel(%arg0: i32, %arg1: memref<8x128xf32, #tpu.memory_space<vmem>>, %arg2: memref<8x128xf32, #tpu.memory_space<vmem>>, %arg3: memref<16x128xf32, #tpu.memory_space<vmem>>, %arg4: memref<8x128xf32, #tpu.memory_space<vmem>>) attributes {dimension_semantics = [#tpu.dimension_semantics<parallel>], iteration_bounds = array<i64: 1>, scalar_prefetch = 0 : i64, scratch_operands = 0 : i64, tpu.core_type = #tpu.core_type<tc>, window_params = [{transform_indices = @transform_0, window_bounds = array<i64: 8, 128>}, {transform_indices = @transform_1, window_bounds = array<i64: 8, 128>}, {pipeline_mode = #tpu.pipeline_mode<synchronous>, transform_indices = @transform_2, window_bounds = array<i64: 16, 128>}, {transform_indices = @transform_3, window_bounds = array<i64: 8, 128>}]} {
    %cst = arith.constant 0.000000e+00 : f32
    %0 = vector.broadcast %cst : f32 to vector<8x128xf32>
    %c0 = arith.constant 0 : index
    %c0_0 = arith.constant 0 : index
    %1 = vector.load %arg2[%c0, %c0_0] : memref<8x128xf32, #tpu.memory_space<vmem>>, vector<8x128xf32>
    %c0_1 = arith.constant 0 : index
    %c0_2 = arith.constant 0 : index
    %2 = vector.load %arg3[%c0_1, %c0_2] : memref<16x128xf32, #tpu.memory_space<vmem>>, vector<8x128xf32>
    %c8 = arith.constant 8 : index
    %c0_3 = arith.constant 0 : index
    %3 = vector.load %arg3[%c8, %c0_3] : memref<16x128xf32, #tpu.memory_space<vmem>>, vector<8x128xf32>
    %c0_i32 = arith.constant 0 : i32
    %4 = arith.index_cast %c0_i32 : i32 to index
    %c0_4 = arith.constant 0 : index
    %5 = vector.load %arg1[%4, %c0_4] : memref<8x128xf32, #tpu.memory_space<vmem>>, vector<1x128xf32>
    %6 = vector.broadcast %5 : vector<1x128xf32> to vector<8x128xf32>
    %7 = arith.subf %6, %1 : vector<8x128xf32>
    %8 = math.absf %7 : vector<8x128xf32>
    %cst_5 = arith.constant 1.000000e+00 : f32
    %9 = vector.broadcast %cst_5 : f32 to vector<8x128xf32>
    %10 = arith.minimumf %8, %9 : vector<8x128xf32>
    %cst_6 = arith.constant 5.000000e-01 : f32
    %11 = vector.broadcast %cst_6 : f32 to vector<8x128xf32>
    %12 = arith.mulf %11, %10 : vector<8x128xf32>
    %13 = arith.subf %8, %12 : vector<8x128xf32>
    %14 = arith.mulf %10, %13 : vector<8x128xf32>
    %cst_7 = arith.constant 0.000000e+00 : f32
    %15 = vector.broadcast %cst_7 : f32 to vector<8x128xf32>
    %16 = arith.cmpf olt, %7, %15 : vector<8x128xf32>
    %17 = arith.select %16, %3, %2 : vector<8x128xi1>, vector<8x128xf32>
    %18 = arith.mulf %17, %14 : vector<8x128xf32>
    %19 = arith.addf %0, %18 : vector<8x128xf32>
    %c1_i32 = arith.constant 1 : i32
    %20 = arith.index_cast %c1_i32 : i32 to index
    %c0_8 = arith.constant 0 : index
    %21 = vector.load %arg1[%20, %c0_8] : memref<8x128xf32, #tpu.memory_space<vmem>>, vector<1x128xf32>
    %22 = vector.broadcast %21 : vector<1x128xf32> to vector<8x128xf32>
    %23 = arith.subf %22, %1 : vector<8x128xf32>
    %24 = math.absf %23 : vector<8x128xf32>
    %cst_9 = arith.constant 1.000000e+00 : f32
    %25 = vector.broadcast %cst_9 : f32 to vector<8x128xf32>
    %26 = arith.minimumf %24, %25 : vector<8x128xf32>
    %cst_10 = arith.constant 5.000000e-01 : f32
    %27 = vector.broadcast %cst_10 : f32 to vector<8x128xf32>
    %28 = arith.mulf %27, %26 : vector<8x128xf32>
    %29 = arith.subf %24, %28 : vector<8x128xf32>
    %30 = arith.mulf %26, %29 : vector<8x128xf32>
    %cst_11 = arith.constant 0.000000e+00 : f32
    %31 = vector.broadcast %cst_11 : f32 to vector<8x128xf32>
    %32 = arith.cmpf olt, %23, %31 : vector<8x128xf32>
    %33 = arith.select %32, %3, %2 : vector<8x128xi1>, vector<8x128xf32>
    %34 = arith.mulf %33, %30 : vector<8x128xf32>
    %35 = arith.addf %19, %34 : vector<8x128xf32>
    %c2_i32 = arith.constant 2 : i32
    %36 = arith.index_cast %c2_i32 : i32 to index
    %c0_12 = arith.constant 0 : index
    %37 = vector.load %arg1[%36, %c0_12] : memref<8x128xf32, #tpu.memory_space<vmem>>, vector<1x128xf32>
    %38 = vector.broadcast %37 : vector<1x128xf32> to vector<8x128xf32>
    %39 = arith.subf %38, %1 : vector<8x128xf32>
    %40 = math.absf %39 : vector<8x128xf32>
    %cst_13 = arith.constant 1.000000e+00 : f32
    %41 = vector.broadcast %cst_13 : f32 to vector<8x128xf32>
    %42 = arith.minimumf %40, %41 : vector<8x128xf32>
    %cst_14 = arith.constant 5.000000e-01 : f32
    %43 = vector.broadcast %cst_14 : f32 to vector<8x128xf32>
    %44 = arith.mulf %43, %42 : vector<8x128xf32>
    %45 = arith.subf %40, %44 : vector<8x128xf32>
    %46 = arith.mulf %42, %45 : vector<8x128xf32>
    %cst_15 = arith.constant 0.000000e+00 : f32
    %47 = vector.broadcast %cst_15 : f32 to vector<8x128xf32>
    %48 = arith.cmpf olt, %39, %47 : vector<8x128xf32>
    %49 = arith.select %48, %3, %2 : vector<8x128xi1>, vector<8x128xf32>
    %50 = arith.mulf %49, %46 : vector<8x128xf32>
    %51 = arith.addf %35, %50 : vector<8x128xf32>
    %c3_i32 = arith.constant 3 : i32
    %52 = arith.index_cast %c3_i32 : i32 to index
    %c0_16 = arith.constant 0 : index
    %53 = vector.load %arg1[%52, %c0_16] : memref<8x128xf32, #tpu.memory_space<vmem>>, vector<1x128xf32>
    %54 = vector.broadcast %53 : vector<1x128xf32> to vector<8x128xf32>
    %55 = arith.subf %54, %1 : vector<8x128xf32>
    %56 = math.absf %55 : vector<8x128xf32>
    %cst_17 = arith.constant 1.000000e+00 : f32
    %57 = vector.broadcast %cst_17 : f32 to vector<8x128xf32>
    %58 = arith.minimumf %56, %57 : vector<8x128xf32>
    %cst_18 = arith.constant 5.000000e-01 : f32
    %59 = vector.broadcast %cst_18 : f32 to vector<8x128xf32>
    %60 = arith.mulf %59, %58 : vector<8x128xf32>
    %61 = arith.subf %56, %60 : vector<8x128xf32>
    %62 = arith.mulf %58, %61 : vector<8x128xf32>
    %cst_19 = arith.constant 0.000000e+00 : f32
    %63 = vector.broadcast %cst_19 : f32 to vector<8x128xf32>
    %64 = arith.cmpf olt, %55, %63 : vector<8x128xf32>
    %65 = arith.select %64, %3, %2 : vector<8x128xi1>, vector<8x128xf32>
    %66 = arith.mulf %65, %62 : vector<8x128xf32>
    %67 = arith.addf %51, %66 : vector<8x128xf32>
    %c4_i32 = arith.constant 4 : i32
    %68 = arith.index_cast %c4_i32 : i32 to index
    %c0_20 = arith.constant 0 : index
    %69 = vector.load %arg1[%68, %c0_20] : memref<8x128xf32, #tpu.memory_space<vmem>>, vector<1x128xf32>
    %70 = vector.broadcast %69 : vector<1x128xf32> to vector<8x128xf32>
    %71 = arith.subf %70, %1 : vector<8x128xf32>
    %72 = math.absf %71 : vector<8x128xf32>
    %cst_21 = arith.constant 1.000000e+00 : f32
    %73 = vector.broadcast %cst_21 : f32 to vector<8x128xf32>
    %74 = arith.minimumf %72, %73 : vector<8x128xf32>
    %cst_22 = arith.constant 5.000000e-01 : f32
    %75 = vector.broadcast %cst_22 : f32 to vector<8x128xf32>
    %76 = arith.mulf %75, %74 : vector<8x128xf32>
    %77 = arith.subf %72, %76 : vector<8x128xf32>
    %78 = arith.mulf %74, %77 : vector<8x128xf32>
    %cst_23 = arith.constant 0.000000e+00 : f32
    %79 = vector.broadcast %cst_23 : f32 to vector<8x128xf32>
    %80 = arith.cmpf olt, %71, %79 : vector<8x128xf32>
    %81 = arith.select %80, %3, %2 : vector<8x128xi1>, vector<8x128xf32>
    %82 = arith.mulf %81, %78 : vector<8x128xf32>
    %83 = arith.addf %67, %82 : vector<8x128xf32>
    %c5_i32 = arith.constant 5 : i32
    %84 = arith.index_cast %c5_i32 : i32 to index
    %c0_24 = arith.constant 0 : index
    %85 = vector.load %arg1[%84, %c0_24] : memref<8x128xf32, #tpu.memory_space<vmem>>, vector<1x128xf32>
    %86 = vector.broadcast %85 : vector<1x128xf32> to vector<8x128xf32>
    %87 = arith.subf %86, %1 : vector<8x128xf32>
    %88 = math.absf %87 : vector<8x128xf32>
    %cst_25 = arith.constant 1.000000e+00 : f32
    %89 = vector.broadcast %cst_25 : f32 to vector<8x128xf32>
    %90 = arith.minimumf %88, %89 : vector<8x128xf32>
    %cst_26 = arith.constant 5.000000e-01 : f32
    %91 = vector.broadcast %cst_26 : f32 to vector<8x128xf32>
    %92 = arith.mulf %91, %90 : vector<8x128xf32>
    %93 = arith.subf %88, %92 : vector<8x128xf32>
    %94 = arith.mulf %90, %93 : vector<8x128xf32>
    %cst_27 = arith.constant 0.000000e+00 : f32
    %95 = vector.broadcast %cst_27 : f32 to vector<8x128xf32>
    %96 = arith.cmpf olt, %87, %95 : vector<8x128xf32>
    %97 = arith.select %96, %3, %2 : vector<8x128xi1>, vector<8x128xf32>
    %98 = arith.mulf %97, %94 : vector<8x128xf32>
    %99 = arith.addf %83, %98 : vector<8x128xf32>
    %c6_i32 = arith.constant 6 : i32
    %100 = arith.index_cast %c6_i32 : i32 to index
    %c0_28 = arith.constant 0 : index
    %101 = vector.load %arg1[%100, %c0_28] : memref<8x128xf32, #tpu.memory_space<vmem>>, vector<1x128xf32>
    %102 = vector.broadcast %101 : vector<1x128xf32> to vector<8x128xf32>
    %103 = arith.subf %102, %1 : vector<8x128xf32>
    %104 = math.absf %103 : vector<8x128xf32>
    %cst_29 = arith.constant 1.000000e+00 : f32
    %105 = vector.broadcast %cst_29 : f32 to vector<8x128xf32>
    %106 = arith.minimumf %104, %105 : vector<8x128xf32>
    %cst_30 = arith.constant 5.000000e-01 : f32
    %107 = vector.broadcast %cst_30 : f32 to vector<8x128xf32>
    %108 = arith.mulf %107, %106 : vector<8x128xf32>
    %109 = arith.subf %104, %108 : vector<8x128xf32>
    %110 = arith.mulf %106, %109 : vector<8x128xf32>
    %cst_31 = arith.constant 0.000000e+00 : f32
    %111 = vector.broadcast %cst_31 : f32 to vector<8x128xf32>
    %112 = arith.cmpf olt, %103, %111 : vector<8x128xf32>
    %113 = arith.select %112, %3, %2 : vector<8x128xi1>, vector<8x128xf32>
    %114 = arith.mulf %113, %110 : vector<8x128xf32>
    %115 = arith.addf %99, %114 : vector<8x128xf32>
    %c7_i32 = arith.constant 7 : i32
    %116 = arith.index_cast %c7_i32 : i32 to index
    %c0_32 = arith.constant 0 : index
    %117 = vector.load %arg1[%116, %c0_32] : memref<8x128xf32, #tpu.memory_space<vmem>>, vector<1x128xf32>
    %118 = vector.broadcast %117 : vector<1x128xf32> to vector<8x128xf32>
    %119 = arith.subf %118, %1 : vector<8x128xf32>
    %120 = math.absf %119 : vector<8x128xf32>
    %cst_33 = arith.constant 1.000000e+00 : f32
    %121 = vector.broadcast %cst_33 : f32 to vector<8x128xf32>
    %122 = arith.minimumf %120, %121 : vector<8x128xf32>
    %cst_34 = arith.constant 5.000000e-01 : f32
    %123 = vector.broadcast %cst_34 : f32 to vector<8x128xf32>
    %124 = arith.mulf %123, %122 : vector<8x128xf32>
    %125 = arith.subf %120, %124 : vector<8x128xf32>
    %126 = arith.mulf %122, %125 : vector<8x128xf32>
    %cst_35 = arith.constant 0.000000e+00 : f32
    %127 = vector.broadcast %cst_35 : f32 to vector<8x128xf32>
    %128 = arith.cmpf olt, %119, %127 : vector<8x128xf32>
    %129 = arith.select %128, %3, %2 : vector<8x128xi1>, vector<8x128xf32>
    %130 = arith.mulf %129, %126 : vector<8x128xf32>
    %131 = arith.addf %115, %130 : vector<8x128xf32>
    %c8_i32 = arith.constant 8 : i32
    %132 = vector.shape_cast %131 : vector<8x128xf32> to vector<1x8x128xf32>
    %cst_36 = arith.constant dense<0.000000e+00> : vector<8x128xf32>
    %133 = vector.multi_reduction <add>, %132, %cst_36 [0] : vector<1x8x128xf32> to vector<8x128xf32>
    %c0_37 = arith.constant 0 : index
    %c0_38 = arith.constant 0 : index
    %134 = vector.load %arg4[%c0_37, %c0_38] : memref<8x128xf32, #tpu.memory_space<vmem>>, vector<8x128xf32>
    tpu.vector_store %arg4[%c0_37, %c0_38], %133 {strides = array<i32>} : memref<8x128xf32, #tpu.memory_space<vmem>>, vector<8x128xf32>,
    return
  }
  func.func @transform_0(%arg0: i32) -> (i32, i32) {
    %c0_i32 = arith.constant 0 : i32
    %c0_i32_0 = arith.constant 0 : i32
    return %c0_i32, %arg0 : i32, i32
  }
  func.func @transform_1(%arg0: i32) -> (i32, i32) {
    %c0_i32 = arith.constant 0 : i32
    %c0_i32_0 = arith.constant 0 : i32
    return %c0_i32, %arg0 : i32, i32
  }
  func.func @transform_2(%arg0: i32) -> (i32, i32) {
    %c0_i32 = arith.constant 0 : i32
    %c0_i32_0 = arith.constant 0 : i32
    %c0_i32_1 = arith.constant 0 : i32
    return %c0_i32, %c0_i32_0 : i32, i32
  }
  func.func @transform_3(%arg0: i32) -> (i32, i32) {
    %c0_i32 = arith.constant 0 : i32
    %c0_i32_0 = arith.constant 0 : i32
    return %arg0, %c0_i32 : i32, i32
  }
}

</mosaic_0001>

<bundles_post_ra>
// kernel: tpu_custom_call.1
= control target key start
LH: loop header
LB: loop body
LE: loop exit
PB: predicated region body
PF: predicated region fallthrough
CT: control target
= control target key end

     0   :  { %8 = vsyncpa [#allocation3], 0  ;;  %s353_s0 = inlined_call_operand.hbm [shape: f32[8,128], index: 0, kind: input, shape index: {}]   ;;  %s354_s1 = inlined_call_operand.hbm [shape: f32[8,128], index: 1, kind: input, shape index: {}]   ;;  %s355_s2 = inlined_call_operand.hbm [shape: f32[16,128], index: 2, kind: input, shape index: {}]   ;;  %s356_s3 = inlined_call_operand.hbm [shape: f32[8,128], index: 3, kind: output, shape index: {}]  }
   0x1   :  { %9 = vsyncpa [#allocation6], 0 }
   0x2   :  { %10 = vsyncpa [#allocation4], 0  ;;  %s293_s12 = smov [#allocation5]   ;;  %s294_s14 = smov [#allocation2]  }
   0x3   :  { %s27_s13 = sshll.u32 %s293_s12, 4  ;;  %s17_s15 = sshll.u32 %s294_s14, 4  ;;  %s28_s13 = int_to_ptr.vmem [resolvable:$true] %s27_s13  ;;  %s18_s15 = int_to_ptr.vmem [resolvable:$true] %s17_s15 }
   0x4   :  { %s215_s16 = scalar_lea.vmem %s28_s13, 128  ;;  %p220_p1 = scmp.lt.s32.totalorder %s28_s13, %s28_s13 }
   0x5   :  { %p216_p0 = scmp.ne.s32.totalorder %s28_s13, %s215_s16  ;;  %p221_p2 = scmp.lt.s32.totalorder %s215_s16, %s215_s16 }
   0x7   :  { %p222_p3 = por %p221_p2, %p220_p1 }
   0x9   :  { %p223_p4 = pnand %p222_p3, %p216_p0 }
   0xb   :  { %226 = shalt.err (!%p223_p4)
}
   0xc   :  { %30 = dma.hbm_to_vmem [thread:$0]  %s354_s1, 128, %s28_s13, [#allocation6]  }
   0xd   :  { %s235_s19 = scalar_lea.vmem %s18_s15, 128  ;;  %p240_p6 = scmp.lt.s32.totalorder %s18_s15, %s18_s15 }
   0xe   :  { %p236_p5 = scmp.ne.s32.totalorder %s18_s15, %s235_s19  ;;  %p241_p7 = scmp.lt.s32.totalorder %s235_s19, %s235_s19 }
  0x10   :  { %p242_p8 = por %p241_p7, %p240_p6 }
  0x12   :  { %p243_p9 = pnand %p242_p8, %p236_p5 }
  0x14   :  { %246 = shalt.err (!%p243_p9)
}
  0x15   :  { %20 = dma.hbm_to_vmem [thread:$0]  %s353_s0, 128, %s18_s15, [#allocation3]  }
  0x16   :  { %s295_s22 = smov [#allocation7]  }
  0x17   :  { %s36_s23 = sshll.u32 %s295_s22, 4  ;;  %s37_s23 = int_to_ptr.vmem [resolvable:$true] %s36_s23 }
  0x18   :  { %s255_s24 = scalar_lea.vmem %s37_s23, 256  ;;  %p260_p11 = scmp.lt.s32.totalorder %s37_s23, %s37_s23 }
  0x19   :  { %p256_p10 = scmp.ne.s32.totalorder %s37_s23, %s255_s24  ;;  %p261_p12 = scmp.lt.s32.totalorder %s255_s24, %s255_s24 }
  0x1b   :  { %p262_p13 = por %p261_p12, %p260_p11 }
  0x1d   :  { %p263_p0 = pnand %p262_p13, %p256_p10 }
  0x1f   :  { %266 = shalt.err (!%p263_p0)
}
  0x20   :  { %s296_s1 = smov 128   ;;  %s297_s25 = smov 8  }
  0x21   :  { %42 = dma.hbm_to_vmem [thread:$0]  %s355_s2, 256, %s37_s23, [#allocation6], %s296_s1, %s296_s1, %s297_s25  }
  0x22   :  { %287 = dma.done.wait [#allocation3], 128  }
  0x23   :  { %288 = vsyncadd [#allocation3], 4294967168 }
  0x24   :  { %289 = dma.done.wait [#allocation6], 384  }
  0x25   :  { %290 = vsyncadd [#allocation6], 4294966912  ;;  %v52_v0 = vld [vmem:[#allocation5] sm:$0xff]  ;;  %v193_v1 = vld [vmem:[#allocation2] ss:$0 sm:$0xff]  ;;  %s298_s0 = smov [#allocation8]  }
  0x26   :  { %v194_v2 = vld [vmem:[#allocation2 + $0x1] ss:$0 sm:$0xff]  ;;  %v195_v3 = vld [vmem:[#allocation2 + $0x2] ss:$0 sm:$0xff]  ;;  %v60_v4 = vsub.f32 %v193_v1, %v52_v0  ;;  %v196_v7 = vld [vmem:[#allocation2 + $0x3] ss:$0 sm:$0xff] }
  0x27   :  { %v75_v5 = vsub.f32 %v194_v2, %v52_v0  ;;  %v90_v6 = vsub.f32 %v195_v3, %v52_v0  ;;  %v197_v8 = vld [vmem:[#allocation2 + $0x4] ss:$0 sm:$0xff]  ;;  %v198_v9 = vld [vmem:[#allocation2 + $0x5] ss:$0 sm:$0xff]  ;;  %v328_v10 = vld [vmem:[#allocation7] sm:$0xff]  ;;  %v105_v12 = vsub.f32 %v196_v7, %v52_v0  ;;  %s183_s2 = sshll.u32 %s298_s0, 4  ;;  %s184_s2 = int_to_ptr.vmem [resolvable:$true] %s183_s2 }
  0x28   :  { %v330_v11 = vld [vmem:[#allocation7 + $0x8] sm:$0xff]  ;;  %v120_v13 = vsub.f32 %v197_v8, %v52_v0  ;;  %v61_v14 = vand.u32 2147483647, %v60_v4  ;;  %vm66_vm0 = vcmp.lt.f32.partialorder %v60_v4, 0.0  ;;  %v135_v17 = vsub.f32 %v198_v9, %v52_v0  ;;  %v199_v29 = vld [vmem:[#allocation2 + $0x6] ss:$0 sm:$0xff]  ;;  %p272_p2 = scmp.lt.s32.totalorder %s184_s2, %s184_s2 }
  0x29   :  { %v76_v15 = vand.u32 2147483647, %v75_v5  ;;  %vm81_vm1 = vcmp.lt.f32.partialorder %v75_v5, 0.0  ;;  %v91_v16 = vand.u32 2147483647, %v90_v6  ;;  %vm96_vm2 = vcmp.lt.f32.partialorder %v90_v6, 0.0 }
  0x2a   :  { %v62_v18 = vmin.f32 %v61_v14, 1.0  ;;  %v67_v19 = vsel %vm66_vm0, %v330_v11, %v328_v10  ;;  %v106_v21 = vand.u32 2147483647, %v105_v12  ;;  %v82_v22 = vsel %vm81_vm1, %v330_v11, %v328_v10  ;;  %v200_v37 = vld [vmem:[#allocation2 + $0x7] ss:$0 sm:$0xff]  ;;  %s267_s28 = scalar_lea.vmem %s184_s2, 128 }
  0x2b   :  { %v77_v20 = vmin.f32 %v76_v15, 1.0  ;;  %v92_v23 = vmin.f32 %v91_v16, 1.0  ;;  %vm111_vm3 = vcmp.lt.f32.partialorder %v105_v12, 0.0  ;;  %v121_v24 = vand.u32 2147483647, %v120_v13  ;;  %p268_p1 = scmp.ne.s32.totalorder %s184_s2, %s267_s28  ;;  %p273_p3 = scmp.lt.s32.totalorder %s267_s28, %s267_s28 }
  0x2c   :  { %v63_v25 = vmul.f32 0.5, %v62_v18  ;;  %v97_v27 = vsel %vm96_vm2, %v330_v11, %v328_v10  ;;  %v107_v28 = vmin.f32 %v106_v21, 1.0  ;;  %vm126_vm4 = vcmp.lt.f32.partialorder %v120_v13, 0.0 }
  0x2d   :  { %v78_v26 = vmul.f32 0.5, %v77_v20  ;;  %v93_v30 = vmul.f32 0.5, %v92_v23  ;;  %v122_v31 = vmin.f32 %v121_v24, 1.0  ;;  %v136_v32 = vand.u32 2147483647, %v135_v17  ;;  %p274_p4 = por %p273_p3, %p272_p2 }
  0x2e   :  { %v64_v33 = vsub.f32 %v61_v14, %v63_v25  ;;  %v108_v35 = vmul.f32 0.5, %v107_v28  ;;  %v112_v36 = vsel %vm111_vm3, %v330_v11, %v328_v10  ;;  %vm141_vm5 = vcmp.lt.f32.partialorder %v135_v17, 0.0 }
  0x2f   :  { %v79_v34 = vsub.f32 %v76_v15, %v78_v26  ;;  %v94_v38 = vsub.f32 %v91_v16, %v93_v30  ;;  %v123_v39 = vmul.f32 0.5, %v122_v31  ;;  %v137_v40 = vmin.f32 %v136_v32, 1.0  ;;  %p275_p5 = pnand %p274_p4, %p268_p1 }
  0x30   :  { %v65_v41 = vmul.f32 %v64_v33, %v62_v18  ;;  %v109_v43 = vsub.f32 %v106_v21, %v108_v35  ;;  %v150_v44 = vsub.f32 %v199_v29, %v52_v0  ;;  %v165_v48 = vsub.f32 %v200_v37, %v52_v0 }
  0x31   :  { %v80_v42 = vmul.f32 %v79_v34, %v77_v20  ;;  %v95_v45 = vmul.f32 %v94_v38, %v92_v23  ;;  %v124_v46 = vsub.f32 %v121_v24, %v123_v39  ;;  %v138_v47 = vmul.f32 0.5, %v137_v40 }
  0x32   :  { %v68_v49 = vmul.f32 %v67_v19, %v65_v41  ;;  %v110_v51 = vmul.f32 %v109_v43, %v107_v28  ;;  %v151_v52 = vand.u32 2147483647, %v150_v44  ;;  %v127_v55 = vsel %vm126_vm4, %v330_v11, %v328_v10 }
  0x33   :  { %v83_v50 = vmul.f32 %v82_v22, %v80_v42  ;;  %v98_v53 = vmul.f32 %v97_v27, %v95_v45  ;;  %v125_v54 = vmul.f32 %v124_v46, %v122_v31  ;;  %v139_v56 = vsub.f32 %v136_v32, %v138_v47 }
  0x34   :  { %v113_v58 = vmul.f32 %v112_v36, %v110_v51  ;;  %v152_v59 = vmin.f32 %v151_v52, 1.0  ;;  %v142_v61 = vsel %vm141_vm5, %v330_v11, %v328_v10  ;;  %v166_v62 = vand.u32 2147483647, %v165_v48 }
  0x35   :  { %v84_v57 = vadd.f32 %v83_v50, %v68_v49  ;;  %v140_v60 = vmul.f32 %v139_v56, %v137_v40  ;;  %v128_v0 = vmul.f32 %v127_v55, %v125_v54  ;;  %vm156_vm6 = vcmp.lt.f32.partialorder %v150_v44, 0.0 }
  0x36   :  { %v153_v1 = vmul.f32 0.5, %v152_v59  ;;  %v167_v2 = vmin.f32 %v166_v62, 1.0  ;;  %v157_v6 = vsel %vm156_vm6, %v330_v11, %v328_v10  ;;  %vm171_vm7 = vcmp.lt.f32.partialorder %v165_v48, 0.0 }
  0x37   :  { %v99_v63 = vadd.f32 %v98_v53, %v84_v57  ;;  %v143_v4 = vmul.f32 %v142_v61, %v140_v60  ;;  %v172_v15 = vsel %vm171_vm7, %v330_v11, %v328_v10 }
  0x38   :  { %v154_v5 = vsub.f32 %v151_v52, %v153_v1  ;;  %v168_v7 = vmul.f32 0.5, %v167_v2 }
  0x39   :  { %v114_v3 = vadd.f32 %v113_v58, %v99_v63 }
  0x3a   :  { %v155_v9 = vmul.f32 %v154_v5, %v152_v59  ;;  %v169_v12 = vsub.f32 %v166_v62, %v168_v7 }
  0x3b   :  { %v129_v8 = vadd.f32 %v128_v0, %v114_v3 }
  0x3c   :  { %v158_v14 = vmul.f32 %v157_v6, %v155_v9  ;;  %v170_v16 = vmul.f32 %v169_v12, %v167_v2 }
  0x3d   :  { %v144_v13 = vadd.f32 %v143_v4, %v129_v8 }
  0x3e   :  { %v173_v18 = vmul.f32 %v172_v15, %v170_v16 }
  0x3f   :  { %v159_v17 = vadd.f32 %v158_v14, %v144_v13 }
  0x41   :  { %v174_v19 = vadd.f32 %v173_v18, %v159_v17 }
  0x43   :  { %176 = vst [vmem:[#allocation8] sm:$0xff] %v174_v19 }
  0x44   :  { %278 = shalt.err (!%p275_p5)
}
  0x45   :  { %186 = dma.vmem_to_hbm [thread:$0]  %s184_s2, 128, %s356_s3, [#allocation4]  }
  0x46   :  { %291 = dma.done.wait [#allocation4], 128  }
  0x47   :  { %292 = vsyncadd [#allocation4], 4294967168 }
  0x48   :  { %190 = vsyncpa [#allocation3], 1 }
  0x49   :  { %191 = vsyncpa [#allocation6], 1 }
  0x4a   :  { %192 = vsyncpa [#allocation4], 1 }

</bundles_post_ra>
